<compile_context>
chip_gen: v6e
topology: v6e:2x2x1
jax: 0.10.0
libtpu: 0.0.40
codegen_flags: <defaults>
</compile_context>

<pallas_src>
import functools

import jax
import jax.numpy as jnp
from jax.experimental import pallas as pl
from jax.experimental.pallas import tpu as pltpu

LN_EPS = 1e-5


def meanmlp_kernel(x_ref, w1_ref, b1_ref, g_ref, beta_ref, w2_ref, b2_ref,
                   feat_ref, logit_ref, acc_ref, *, inv_h, inv_t):
    """One (batch-chunk, time-chunk) grid step.

    x_ref    : [block_b, block_t, C]   bf16/f32
    w1_ref   : [C, H_pad]              zero-padded columns H..H_pad
    b1/g/beta: [1, H_pad]              zero-padded
    w2_ref   : [H_pad, O_pad]          zero-padded
    b2_ref   : [1, O_pad]
    feat_ref : [block_b, H_pad]        output (written at last time step)
    logit_ref: [block_b, O_pad]        output (written at last time step)
    acc_ref  : [block_b, H_pad] f32    scratch time-sum accumulator
    """
    t = pl.program_id(1)

    @pl.when(t == 0)
    def _init():
        acc_ref[...] = jnp.zeros_like(acc_ref)

    bb, bt, C = x_ref.shape
    Hp = w1_ref.shape[1]

    # Encoder Linear(C -> H_pad): one MXU matmul for the whole chunk.
    # block_t is a multiple of 8, so this reshape is a layout no-op.
    x = x_ref[...].reshape(bb * bt, C)
    h = jnp.dot(x, w1_ref[...], preferred_element_type=jnp.float32)
    h = h + b1_ref[...]

    # LayerNorm over the hidden dim, single-pass statistics in f32.
    # Pad lanes of h are exactly zero (zero W1 cols / zero b1), so summing over
    # all H_pad lanes and dividing by the true H is exact.
    s1 = jnp.sum(h, axis=-1, keepdims=True)
    s2 = jnp.sum(h * h, axis=-1, keepdims=True)
    mu = s1 * inv_h
    var = s2 * inv_h - mu * mu
    inv_std = jax.lax.rsqrt(var + LN_EPS)          # EUP slot, ~free
    scale = g_ref[...] * inv_std                   # pad lanes: gamma = 0 -> 0
    shift = beta_ref[...] - mu * scale
    h = jnp.maximum(h * scale + shift, 0.0)        # fused LN affine + ReLU

    # Accumulate the time-sum for this batch chunk.
    acc_ref[...] += jnp.sum(h.reshape(bb, bt, Hp), axis=1)

    @pl.when(t == pl.num_programs(1) - 1)
    def _finalize():
        feat = acc_ref[...] * inv_t                # mean over time, f32
        feat_ref[...] = feat.astype(feat_ref.dtype)
        logits = jnp.dot(feat.astype(w2_ref.dtype), w2_ref[...],
                         preferred_element_type=jnp.float32)
        logit_ref[...] = (logits + b2_ref[...]).astype(logit_ref.dtype)


def _default_block_t(T):
    # Prefer a divisor of T that is a multiple of 16 (bf16 sublane packing),
    # else 8; fall back to the whole time axis.
    for step in (16, 8):
        if T % step == 0:
            bt = min(T, 128)
            bt -= bt % step
            while bt > step and T % bt != 0:
                bt -= step
            if T % bt == 0:
                return bt
    return T


def _default_block_b(B, block_t):
    # >= 2 batch chunks when B allows (v7x dual-TC + pipelining).  block_b must
    # be a multiple of 8 (sublane rule for the [block_b, H_pad] output tiles)
    # or equal to B.
    if B < 16 or B % 8 != 0:
        return B
    rows_target = 1024                              # ~full MXU M tiles, modest VMEM
    bb = min(B // 2, max(8, rows_target // max(block_t, 1)))
    bb -= bb % 8
    bb = max(bb, 8)
    while bb >= 8 and B % bb != 0:
        bb -= 8
    return bb if bb >= 8 and B % bb == 0 else B


def meanmlp_forward(x, w1, b1, gamma, beta, w2, b2, *,
                    block_b=None, block_t=None, use_bf16=True):
    B, T, C = x.shape
    H = w1.shape[1]
    O = w2.shape[1]

    if block_t is None:
        block_t = _default_block_t(T)
    if block_b is None:
        block_b = _default_block_b(B, block_t)
    assert T % block_t == 0 and (block_t == T or block_t % 8 == 0), (T, block_t)
    assert B % block_b == 0 and (block_b == B or block_b % 8 == 0), (B, block_b)
    grid = (B // block_b, T // block_t)

    # Lane-dense padding: H 160 -> 256, O 2 -> 128 (unmasked full-lane stores).
    H_pad = ((H + 127) // 128) * 128
    O_pad = ((O + 127) // 128) * 128

    wdtype = jnp.bfloat16 if use_bf16 else jnp.float32
    x_c = x.astype(wdtype)
    w1_p = jnp.zeros((C, H_pad), wdtype).at[:, :H].set(w1.astype(wdtype))
    w2_p = jnp.zeros((H_pad, O_pad), wdtype).at[:H, :O].set(w2.astype(wdtype))
    b1_p = jnp.zeros((1, H_pad), jnp.float32).at[0, :H].set(b1.astype(jnp.float32))
    g_p = jnp.zeros((1, H_pad), jnp.float32).at[0, :H].set(gamma.astype(jnp.float32))
    beta_p = jnp.zeros((1, H_pad), jnp.float32).at[0, :H].set(beta.astype(jnp.float32))
    b2_p = jnp.zeros((1, O_pad), jnp.float32).at[0, :O].set(b2.astype(jnp.float32))

    kernel = functools.partial(meanmlp_kernel, inv_h=1.0 / H, inv_t=1.0 / T)

    params_bytes = sum(int(a.size) * a.dtype.itemsize
                       for a in (w1_p, b1_p, g_p, beta_p, w2_p, b2_p))
    cost = pl.CostEstimate(
        flops=int(2 * B * T * C * H_pad + 2 * B * H_pad * O_pad
                  + 12 * B * T * H_pad),
        transcendentals=int(B * T),
        bytes_accessed=int(int(x_c.size) * x_c.dtype.itemsize + params_bytes
                           + B * (H_pad + O_pad) * 4),
    )

    feat_pad, logits_pad = pl.pallas_call(
        kernel,
        out_shape=(
            jax.ShapeDtypeStruct((B, H_pad), jnp.float32),
            jax.ShapeDtypeStruct((B, O_pad), jnp.float32),
        ),
        grid=grid,
        in_specs=[
            pl.BlockSpec((block_b, block_t, C), lambda i, t: (i, t, 0)),  # x tile
            pl.BlockSpec((C, H_pad), lambda i, t: (0, 0)),                # W1
            pl.BlockSpec((1, H_pad), lambda i, t: (0, 0)),                # b1
            pl.BlockSpec((1, H_pad), lambda i, t: (0, 0)),                # gamma
            pl.BlockSpec((1, H_pad), lambda i, t: (0, 0)),                # beta
            pl.BlockSpec((H_pad, O_pad), lambda i, t: (0, 0)),            # W2
            pl.BlockSpec((1, O_pad), lambda i, t: (0, 0)),                # b2
        ],
        out_specs=(
            pl.BlockSpec((block_b, H_pad), lambda i, t: (i, 0)),          # features
            pl.BlockSpec((block_b, O_pad), lambda i, t: (i, 0)),          # logits
        ),
        scratch_shapes=[pltpu.VMEM((block_b, H_pad), jnp.float32)],
        compiler_params=pltpu.CompilerParams(
            dimension_semantics=("parallel", "arbitrary"),
            vmem_limit_bytes=32 * 1024 * 1024,
        ),
        cost_estimate=cost,
    )(x_c, w1_p, b1_p, g_p, beta_p, w2_p, b2_p)

    return feat_pad[:, :H], logits_pad[:, :O]


def reference_forward(x, w1, b1, gamma, beta, w2, b2):
    hp = jax.lax.Precision.HIGHEST
    h = jnp.einsum("btc,ch->bth", x, w1, precision=hp) + b1
    mu = jnp.mean(h, axis=-1, keepdims=True)
    var = jnp.mean((h - mu) ** 2, axis=-1, keepdims=True)
    h = (h - mu) / jnp.sqrt(var + LN_EPS)
    h = h * gamma + beta
    h = jnp.maximum(h, 0.0)
    feat = jnp.mean(h, axis=1)
    logits = jnp.dot(feat, w2, precision=hp) + b2
    return feat, logits


if __name__ == "__main__":
    # Small shapes consistent with the module: B=2 batches, T=32 timepoints,
    # C=16 ROIs (input_size), H=160 hidden (module default), O=2 classes.
    B, T, C, H, O = 2, 32, 16, 160, 2

    key = jax.random.PRNGKey(0)
    kx, kw1, kb1, kw2, kb2 = jax.random.split(key, 5)

    x = jax.random.normal(kx, (B, T, C), dtype=jnp.float32)
    w1 = jax.random.normal(kw1, (C, H), dtype=jnp.float32) * (1.0 / jnp.sqrt(C))
    b1 = jax.random.normal(kb1, (H,), dtype=jnp.float32) * 0.01
    gamma = jnp.ones((H,), dtype=jnp.float32)      # LayerNorm weight init
    beta = jnp.zeros((H,), dtype=jnp.float32)      # LayerNorm bias init
    w2 = jax.random.normal(kw2, (H, O), dtype=jnp.float32) * (1.0 / jnp.sqrt(H))
    b2 = jax.random.normal(kb2, (O,), dtype=jnp.float32) * 0.01

    feat_ref, logits_ref = reference_forward(x, w1, b1, gamma, beta, w2, b2)

    # f32 matmul path (block_t=16 -> 2 time steps, exercises the accumulator).
    feat, logits = meanmlp_forward(x, w1, b1, gamma, beta, w2, b2,
                                   block_t=16, use_bf16=False)
    jax.block_until_ready((feat, logits))
    assert feat.shape == (B, H) and logits.shape == (B, O)
    assert jnp.allclose(feat, feat_ref, atol=2e-2, rtol=2e-2)
    assert jnp.allclose(logits, logits_ref, atol=2e-2, rtol=2e-2)

    # bf16 matmul path (perf default; f32 accumulation, loose tolerance).
    feat16, logits16 = meanmlp_forward(x, w1, b1, gamma, beta, w2, b2,
                                       block_t=16, use_bf16=True)
    jax.block_until_ready((feat16, logits16))
    assert feat16.shape == (B, H) and logits16.shape == (B, O)
    assert jnp.allclose(feat16, feat_ref, atol=3e-2, rtol=3e-2)
    assert jnp.allclose(logits16, logits_ref, atol=3e-2, rtol=3e-2)

    print("KERNEL_OK")
</pallas_src>

<mosaic_0001>
module attributes {stable_mosaic.version = 11 : i64} {
  func.func @meanmlp_kernel(%arg0: i32, %arg1: i32, %arg2: memref<2x16x16xf32, #tpu.memory_space<vmem>>, %arg3: memref<16x256xf32, #tpu.memory_space<vmem>>, %arg4: memref<1x256xf32, #tpu.memory_space<vmem>>, %arg5: memref<1x256xf32, #tpu.memory_space<vmem>>, %arg6: memref<1x256xf32, #tpu.memory_space<vmem>>, %arg7: memref<256x128xf32, #tpu.memory_space<vmem>>, %arg8: memref<1x128xf32, #tpu.memory_space<vmem>>, %arg9: memref<2x256xf32, #tpu.memory_space<vmem>>, %arg10: memref<2x128xf32, #tpu.memory_space<vmem>>, %arg11: memref<2x256xf32, #tpu.memory_space<vmem>>) attributes {dimension_semantics = [#tpu.dimension_semantics<parallel>, #tpu.dimension_semantics<arbitrary>], iteration_bounds = array<i64: 1, 2>, scalar_prefetch = 0 : i64, scratch_operands = 1 : i64, tpu.core_type = #tpu.core_type<tc>, window_params = [{transform_indices = @transform_0, window_bounds = array<i64: 2, 16, 16>}, {pipeline_mode = #tpu.pipeline_mode<synchronous>, transform_indices = @transform_1, window_bounds = array<i64: 16, 256>}, {pipeline_mode = #tpu.pipeline_mode<synchronous>, transform_indices = @transform_2, window_bounds = array<i64: 1, 256>}, {pipeline_mode = #tpu.pipeline_mode<synchronous>, transform_indices = @transform_3, window_bounds = array<i64: 1, 256>}, {pipeline_mode = #tpu.pipeline_mode<synchronous>, transform_indices = @transform_4, window_bounds = array<i64: 1, 256>}, {pipeline_mode = #tpu.pipeline_mode<synchronous>, transform_indices = @transform_5, window_bounds = array<i64: 256, 128>}, {pipeline_mode = #tpu.pipeline_mode<synchronous>, transform_indices = @transform_6, window_bounds = array<i64: 1, 128>}, {transform_indices = @transform_7, window_bounds = array<i64: 2, 256>}, {transform_indices = @transform_8, window_bounds = array<i64: 2, 128>}]} {
    %c0_i32 = arith.constant 0 : i32
    %0 = arith.cmpi eq, %arg1, %c0_i32 : i32
    %1 = arith.extui %0 : i1 to i32
    %c0_i32_0 = arith.constant 0 : i32
    %2 = arith.cmpi ne, %1, %c0_i32_0 : i32
    scf.if %2 {
      %cst_23 = arith.constant 0.000000e+00 : f32
      %45 = vector.broadcast %cst_23 : f32 to vector<2x256xf32>
      %c0_24 = arith.constant 0 : index
      %c0_25 = arith.constant 0 : index
      %46 = vector.load %arg11[%c0_24, %c0_25] : memref<2x256xf32, #tpu.memory_space<vmem>>, vector<2x256xf32>
      tpu.vector_store %arg11[%c0_24, %c0_25], %45 {strides = array<i32>} : memref<2x256xf32, #tpu.memory_space<vmem>>, vector<2x256xf32>,
    } else {
    }
    %c0 = arith.constant 0 : index
    %c0_1 = arith.constant 0 : index
    %c0_2 = arith.constant 0 : index
    %3 = vector.load %arg2[%c0, %c0_1, %c0_2] : memref<2x16x16xf32, #tpu.memory_space<vmem>>, vector<2x16x16xf32>
    %4 = vector.shape_cast %3 : vector<2x16x16xf32> to vector<32x16xf32>
    %c0_3 = arith.constant 0 : index
    %c0_4 = arith.constant 0 : index
    %5 = vector.load %arg3[%c0_3, %c0_4] : memref<16x256xf32, #tpu.memory_space<vmem>>, vector<16x256xf32>
    %cst = arith.constant dense<0.000000e+00> : vector<32x256xf32>
    %6 = tpu.matmul %4, %5, %cst {dimension_numbers = #tpu.dot_dimension_numbers<[1], [0], [0], [1], [0, 0, 1, 1], [], []>} : vector<32x16xf32>, vector<16x256xf32>, vector<32x256xf32> -> vector<32x256xf32>
    %c0_5 = arith.constant 0 : index
    %c0_6 = arith.constant 0 : index
    %7 = vector.load %arg4[%c0_5, %c0_6] : memref<1x256xf32, #tpu.memory_space<vmem>>, vector<1x256xf32>
    %8 = vector.broadcast %7 : vector<1x256xf32> to vector<32x256xf32>
    %9 = arith.addf %6, %8 : vector<32x256xf32>
    %cst_7 = arith.constant dense<0.000000e+00> : vector<32xf32>
    %10 = vector.multi_reduction <add>, %9, %cst_7 [1] : vector<32x256xf32> to vector<32xf32>
    %11 = vector.shape_cast %10 : vector<32xf32> to vector<32x1xf32>
    %12 = arith.mulf %9, %9 : vector<32x256xf32>
    %cst_8 = arith.constant dense<0.000000e+00> : vector<32xf32>
    %13 = vector.multi_reduction <add>, %12, %cst_8 [1] : vector<32x256xf32> to vector<32xf32>
    %14 = vector.shape_cast %13 : vector<32xf32> to vector<32x1xf32>
    %cst_9 = arith.constant 6.250000e-03 : f32
    %15 = vector.broadcast %cst_9 : f32 to vector<32x1xf32>
    %16 = arith.mulf %11, %15 : vector<32x1xf32>
    %cst_10 = arith.constant 6.250000e-03 : f32
    %17 = vector.broadcast %cst_10 : f32 to vector<32x1xf32>
    %18 = arith.mulf %14, %17 : vector<32x1xf32>
    %19 = arith.mulf %16, %16 : vector<32x1xf32>
    %20 = arith.subf %18, %19 : vector<32x1xf32>
    %cst_11 = arith.constant 9.99999974E-6 : f32
    %21 = vector.broadcast %cst_11 : f32 to vector<32x1xf32>
    %22 = arith.addf %20, %21 : vector<32x1xf32>
    %23 = math.rsqrt %22 : vector<32x1xf32>
    %c0_12 = arith.constant 0 : index
    %c0_13 = arith.constant 0 : index
    %24 = vector.load %arg5[%c0_12, %c0_13] : memref<1x256xf32, #tpu.memory_space<vmem>>, vector<1x256xf32>
    %25 = vector.broadcast %24 : vector<1x256xf32> to vector<32x256xf32>
    %26 = vector.broadcast %23 : vector<32x1xf32> to vector<32x256xf32>
    %27 = arith.mulf %25, %26 : vector<32x256xf32>
    %c0_14 = arith.constant 0 : index
    %c0_15 = arith.constant 0 : index
    %28 = vector.load %arg6[%c0_14, %c0_15] : memref<1x256xf32, #tpu.memory_space<vmem>>, vector<1x256xf32>
    %29 = vector.broadcast %16 : vector<32x1xf32> to vector<32x256xf32>
    %30 = arith.mulf %29, %27 : vector<32x256xf32>
    %31 = vector.broadcast %28 : vector<1x256xf32> to vector<32x256xf32>
    %32 = arith.subf %31, %30 : vector<32x256xf32>
    %33 = arith.mulf %9, %27 : vector<32x256xf32>
    %34 = arith.addf %33, %32 : vector<32x256xf32>
    %cst_16 = arith.constant 0.000000e+00 : f32
    %35 = vector.broadcast %cst_16 : f32 to vector<32x256xf32>
    %36 = arith.maximumf %34, %35 : vector<32x256xf32>
    %c0_17 = arith.constant 0 : index
    %c0_18 = arith.constant 0 : index
    %37 = vector.load %arg11[%c0_17, %c0_18] : memref<2x256xf32, #tpu.memory_space<vmem>>, vector<2x256xf32>
    %38 = vector.shape_cast %36 : vector<32x256xf32> to vector<2x16x256xf32>
    %cst_19 = arith.constant dense<0.000000e+00> : vector<2x256xf32>
    %39 = vector.multi_reduction <add>, %38, %cst_19 [1] : vector<2x16x256xf32> to vector<2x256xf32>
    %40 = arith.addf %37, %39 : vector<2x256xf32>
    %c0_20 = arith.constant 0 : index
    %c0_21 = arith.constant 0 : index
    %41 = vector.load %arg11[%c0_20, %c0_21] : memref<2x256xf32, #tpu.memory_space<vmem>>, vector<2x256xf32>
    tpu.vector_store %arg11[%c0_20, %c0_21], %40 {strides = array<i32>} : memref<2x256xf32, #tpu.memory_space<vmem>>, vector<2x256xf32>,
    %c1_i32 = arith.constant 1 : i32
    %42 = arith.cmpi eq, %arg1, %c1_i32 : i32
    %43 = arith.extui %42 : i1 to i32
    %c0_i32_22 = arith.constant 0 : i32
    %44 = arith.cmpi ne, %43, %c0_i32_22 : i32
    scf.if %44 {
      %c0_23 = arith.constant 0 : index
      %c0_24 = arith.constant 0 : index
      %45 = vector.load %arg11[%c0_23, %c0_24] : memref<2x256xf32, #tpu.memory_space<vmem>>, vector<2x256xf32>
      %cst_25 = arith.constant 3.125000e-02 : f32
      %46 = vector.broadcast %cst_25 : f32 to vector<2x256xf32>
      %47 = arith.mulf %45, %46 : vector<2x256xf32>
      %c0_26 = arith.constant 0 : index
      %c0_27 = arith.constant 0 : index
      %48 = vector.load %arg9[%c0_26, %c0_27] : memref<2x256xf32, #tpu.memory_space<vmem>>, vector<2x256xf32>
      tpu.vector_store %arg9[%c0_26, %c0_27], %47 {strides = array<i32>} : memref<2x256xf32, #tpu.memory_space<vmem>>, vector<2x256xf32>,
      %c0_28 = arith.constant 0 : index
      %c0_29 = arith.constant 0 : index
      %49 = vector.load %arg7[%c0_28, %c0_29] : memref<256x128xf32, #tpu.memory_space<vmem>>, vector<256x128xf32>
      %cst_30 = arith.constant dense<0.000000e+00> : vector<2x128xf32>
      %50 = tpu.matmul %47, %49, %cst_30 {dimension_numbers = #tpu.dot_dimension_numbers<[1], [0], [0], [1], [0, 0, 1, 1], [], []>} : vector<2x256xf32>, vector<256x128xf32>, vector<2x128xf32> -> vector<2x128xf32>
      %c0_31 = arith.constant 0 : index
      %c0_32 = arith.constant 0 : index
      %51 = vector.load %arg8[%c0_31, %c0_32] : memref<1x128xf32, #tpu.memory_space<vmem>>, vector<1x128xf32>
      %52 = vector.broadcast %51 : vector<1x128xf32> to vector<2x128xf32>
      %53 = arith.addf %50, %52 : vector<2x128xf32>
      %c0_33 = arith.constant 0 : index
      %c0_34 = arith.constant 0 : index
      %54 = vector.load %arg10[%c0_33, %c0_34] : memref<2x128xf32, #tpu.memory_space<vmem>>, vector<2x128xf32>
      tpu.vector_store %arg10[%c0_33, %c0_34], %53 {strides = array<i32>} : memref<2x128xf32, #tpu.memory_space<vmem>>, vector<2x128xf32>,
    } else {
    }
    return
  }
  func.func @transform_0(%arg0: i32, %arg1: i32) -> (i32, i32, i32) {
    %c0_i32 = arith.constant 0 : i32
    %c0_i32_0 = arith.constant 0 : i32
    return %arg0, %arg1, %c0_i32 : i32, i32, i32
  }
  func.func @transform_1(%arg0: i32, %arg1: i32) -> (i32, i32) {
    %c0_i32 = arith.constant 0 : i32
    %c0_i32_0 = arith.constant 0 : i32
    %c0_i32_1 = arith.constant 0 : i32
    return %c0_i32, %c0_i32_0 : i32, i32
  }
  func.func @transform_2(%arg0: i32, %arg1: i32) -> (i32, i32) {
    %c0_i32 = arith.constant 0 : i32
    %c0_i32_0 = arith.constant 0 : i32
    %c0_i32_1 = arith.constant 0 : i32
    return %c0_i32, %c0_i32_0 : i32, i32
  }
  func.func @transform_3(%arg0: i32, %arg1: i32) -> (i32, i32) {
    %c0_i32 = arith.constant 0 : i32
    %c0_i32_0 = arith.constant 0 : i32
    %c0_i32_1 = arith.constant 0 : i32
    return %c0_i32, %c0_i32_0 : i32, i32
  }
  func.func @transform_4(%arg0: i32, %arg1: i32) -> (i32, i32) {
    %c0_i32 = arith.constant 0 : i32
    %c0_i32_0 = arith.constant 0 : i32
    %c0_i32_1 = arith.constant 0 : i32
    return %c0_i32, %c0_i32_0 : i32, i32
  }
  func.func @transform_5(%arg0: i32, %arg1: i32) -> (i32, i32) {
    %c0_i32 = arith.constant 0 : i32
    %c0_i32_0 = arith.constant 0 : i32
    %c0_i32_1 = arith.constant 0 : i32
    return %c0_i32, %c0_i32_0 : i32, i32
  }
  func.func @transform_6(%arg0: i32, %arg1: i32) -> (i32, i32) {
    %c0_i32 = arith.constant 0 : i32
    %c0_i32_0 = arith.constant 0 : i32
    %c0_i32_1 = arith.constant 0 : i32
    return %c0_i32, %c0_i32_0 : i32, i32
  }
  func.func @transform_7(%arg0: i32, %arg1: i32) -> (i32, i32) {
    %c0_i32 = arith.constant 0 : i32
    %c0_i32_0 = arith.constant 0 : i32
    return %arg0, %c0_i32 : i32, i32
  }
  func.func @transform_8(%arg0: i32, %arg1: i32) -> (i32, i32) {
    %c0_i32 = arith.constant 0 : i32
    %c0_i32_0 = arith.constant 0 : i32
    return %arg0, %c0_i32 : i32, i32
  }
}

</mosaic_0001>

<bundles_post_ra>
// kernel: tpu_custom_call.1
= control target key start
LH: loop header
LB: loop body
LE: loop exit
PB: predicated region body
PF: predicated region fallthrough
CT: control target
= control target key end

     0   :  { %14 = vsyncpa [#allocation5], 0  ;;  %s1472_s0 = inlined_call_operand.vmem [shape: f32[2,32,16], index: 0, kind: input, shape index: {}]   ;;  %s1473_s1 = inlined_call_operand.vmem [shape: f32[16,256], index: 1, kind: input, shape index: {}]   ;;  %s1474_s2 = inlined_call_operand.vmem [shape: f32[1,256], index: 2, kind: input, shape index: {}]   ;;  %s1475_s3 = inlined_call_operand.vmem [shape: f32[1,256], index: 3, kind: input, shape index: {}]   ;;  %s1476_s4 = inlined_call_operand.vmem [shape: f32[1,256], index: 4, kind: input, shape index: {}]   ;;  %s1477_s5 = inlined_call_operand.hbm [shape: f32[256,128], index: 5, kind: input, shape index: {}]   ;;  %s1478_s6 = inlined_call_operand.vmem [shape: f32[1,128], index: 6, kind: input, shape index: {}]   ;;  %s1479_s7 = inlined_call_operand.hbm [shape: f32[2,256], index: 7, kind: output, shape index: {0}]   ;;  %s1480_s8 = inlined_call_operand.hbm [shape: f32[2,128], index: 8, kind: output, shape index: {1}]  }
   0x1   :  { %15 = vsyncpa [#allocation6], 0 }
   0x2   :  { %16 = vsyncpa [#allocation9], 0  ;;  %s1258_s27 = smov 0   ;;  %s1260_s28 = smov 0  }
   0x3   :  { %s1262_s29 = smov 0   ;;  %s1264_s30 = smov 0  }
   0x4   :  { %s1266_s9 = smov 0  }
   0x5 LB: > { %s938_s10 = sadd.s32 4294967295, %s1203_s9   ;;  %s31_s11 = sadd.s32 1, %s1199_s30  ;;  %s1203_s9 = sphi %s1266_s9, %s22_s9   ;;  %s1199_s30 = sphi %s1264_s30, %s1488_s30   ;;  %s1195_s29 = sphi %s1262_s29, %s1487_s29   ;;  %s1191_s28 = sphi %s1260_s28, %s1486_s28   ;;  %s1187_s27 = sphi %s1258_s27, %s1485_s27  }
   0x6   : > { %p32_p0 = scmp.ge.s32.totalorder %s31_s11, 2  ;;  %s43_s12 = sadd.s32 1, %s1191_s28 }
   0x7   : > { %p50_p1 = scmp.ne.s32.totalorder %s1191_s28, %s1187_s27  ;;  %p51_p2 = scmp.eq.s32.totalorder %s1203_s9, 0 }
   0x8   : > { %s1490_s11 = smov (%p32_p0, %s31_s11), 0  ;;  %p939_p4 = scmp.ge.s32.totalorder %s1203_s9, 1 }
   0x9   : > { %p1291_p3 = por %p51_p2, %p50_p1  ;;  %s39_s14 = ssub.s32 %s1199_s30, %s1490_s11 }
   0xa   : > { %p245_p5 = scmp.lt.s32.totalorder %s1203_s9, 3  ;;  %p41_p6 = scmp.eq.s32.totalorder %s39_s14, 0 }
   0xb   : > { %p1305_p8 = scmp.eq.s32.totalorder %s938_s10, 0  ;;  %s1205_s18 = smov [#allocation4]  }
   0xc   : > { %p1299_p7 = pnand %p939_p4, %p245_p5  ;;  %s269_s19 = sshll.u32 %s1205_s18, 4  ;;  %s270_s19 = int_to_ptr.vmem [resolvable:$true] %s269_s19 }
   0xd   : > { %s1310_s17 = scalar_select %p41_p6, %s1191_s28, %s43_s12  }
   0xe   : > { %p1013_p9 = pneg %p1299_p7  ;;  %s1090_s20 = scalar_lea.vmem %s270_s19, 4096 }
   0xf   : > { %p1091_p12 = scmp.ne.s32.totalorder %s270_s19, %s1090_s20  ;;  %p1098_p1 = scmp.lt.s32.totalorder %s270_s19, %s270_s19 }
  0x10   : > { %p1014_p10 = pnand %p1305_p8, %p1013_p9  ;;  %p1099_p2 = scmp.lt.s32.totalorder %s1090_s20, %s1090_s20 }
  0x12   : > { %p1081_p11 = pneg %p1014_p10  ;;  %p1100_p4 = por %p1099_p2, %p1098_p1 }
  0x14   : > { %p1093_p13 = pnand %p1091_p12, %p1081_p11 }
  0x16   : > { %p1094_p0 = pneg %p1093_p13 }
  0x18   : > { %p1101_p5 = pnand %p1100_p4, %p1094_p0 }
  0x1a   : > { %1104 = shalt.err (!%p1101_p5)
}
  0x1b   : > { %s1206_s21 = smov 128   ;;  %s1207_s22 = smov 8  }
  0x1c   : > { %1016 = dma.hbm_to_vmem [thread:$0]  (!%p1014_p10), %s1477_s5, 4096, %s270_s19, [#allocation5], %s1206_s21, %s1206_s21, %s1207_s22  }
  0x1d   : > { %p941_p6 = scmp.ge.s32.totalorder %s1203_s9, 2 }
  0x1f   : > { %282 = sbr.rel (%p941_p6) target bundleno = 42 (0x2a), region = 40 }
  0x24   : > { %285 = sbr.rel (!%p1291_p3) target bundleno = 42 (0x2a), region = 44  ;;  %s287_s25 = sand.u32 (%p1291_p3), 1, %s1191_s28  }
  0x25   : > { %s961_s26 = sshll.u32 (%p1291_p3), %s1199_s30, 4  ;;  %s942_s12 = sshll.u32 (%p1291_p3), %s287_s25, 5 }
  0x26   : > { %s295_s20 = scalar_lea.vmem (%p1291_p3), %s1472_s0, %s961_s26  ;;  %s289_s23 = scalar_lea.vmem (%p1291_p3), [#allocation3], %s942_s12 }
  0x27   : > { %v330_v0 = vld [vmem:[%s295_s20] sm:$0xff] (%p1291_p3)  ;;  %v332_v1 = vld [vmem:[%s295_s20 + $0x8] sm:$0xff] (%p1291_p3) }
  0x28   : > { %v334_v2 = vld [vmem:[%s295_s20 + $0x20] sm:$0xff] (%p1291_p3)  ;;  %331 = vst [vmem:[%s289_s23] sm:$0xff] (%p1291_p3), %v330_v0  ;;  %333 = vst [vmem:[%s289_s23 + $0x8] sm:$0xff] (%p1291_p3), %v332_v1  ;;  %v336_v3 = vld [vmem:[%s295_s20 + $0x28] sm:$0xff] (%p1291_p3) }
  0x29   : > { %335 = vst [vmem:[%s289_s23 + $0x10] sm:$0xff] %v334_v2  ;;  %337 = vst [vmem:[%s289_s23 + $0x18] sm:$0xff] %v336_v3 }
  0x2a PF: > { %346 = sbr.rel (%p1299_p7) target bundleno = 730 (0x2da), region = 82  ;;  %s349_s13 = sand.u32 (!%p1299_p7), 1, %s1187_s27  }
  0x2b   : > { %s946_s19 = sshll.u32 (!%p1299_p7), %s349_s13, 5 }
  0x2c   : > { %s1330_s21 = scalar_lea.vmem (!%p1299_p7), [#allocation3], %s946_s19 }
  0x2f   : > { %1174 = dma.done.wait (%p1305_p8), [#allocation5], 4096  }
  0x30   : > { %1176 = vsyncadd (%p1305_p8), [#allocation5], 4294963200  ;;  %p948_p3 = scmp.ne.s32.totalorder %s1195_s29, 0 }
  0x32   : > { %386 = sbr.rel (%p948_p3) target bundleno = 57 (0x39), region = 94 }
  0x37   : > { %v1208_v4 = vmov 0.0  }
  0x38   : > { %387 = vst [vmem:[#allocation2] sm:$0xf] %v1208_v4 }
  0x39 PF: > { %v395_v5 = vld [vmem:[%s1473_s1 + $0x18] sm:$0xff]  ;;  %v394_v6 = vld [vmem:[%s1473_s1 + $0x10] sm:$0xff]  ;;  %v393_v7 = vld [vmem:[%s1473_s1 + $0x8] sm:$0xff]  ;;  %vm408_vm0 = vcmask 130048   ;;  %v1209_v11 = vmov 0.0   ;;  %v398_v14 = vlaneseq  ;;  %vm692_vm1 = vcmask 1041409  }
  0x3a   : > { %449 = vmatprep.subr.mxu0 %v395_v5  ;;  %997 = vmatprep.subr.mxu1 %v395_v5  ;;  %v392_v8 = vld [vmem:[%s1473_s1] sm:$0xff]  ;;  %v390_v10 = vld [vmem:[%s1330_s21 + $0x10] sm:$0xff]  ;;  %v389_v12 = vld [vmem:[%s1330_s21 + $0x8] sm:$0xff]  ;;  %vm694_vm2 = vcmask 1043459   ;;  %vm696_vm3 = vcmask 1045509   ;;  %vm698_vm4 = vcmask 1047559  }
  0x3b   : > { %450 = vmatpush1.msra.mxu0 %v394_v6  ;;  %999 = vmatpush1.msra.mxu1 %v394_v6  ;;  %v388_v9 = vld [vmem:[%s1330_s21] sm:$0xff]  ;;  %v391_v13 = vld [vmem:[%s1330_s21 + $0x18] sm:$0xff]  ;;  %v1353_v15 = vshrl.u32 %v398_v14, 7  ;;  %p953_p7 = scmp.ne.s32.totalorder %s1195_s29, 1 }
  0x3c   : > { %451 = vmatprep.subr.mxu0 %v393_v7  ;;  %998 = vmatprep.subr.mxu1 %v393_v7  ;;  %v396_v17 = vld [vmem:[%s1474_s2] sm:$0x3] }
  0x3d   : > { %452 = vmatpush1.msra.mxu0 %v392_v8  ;;  %1000 = vmatpush1.msra.mxu1 %v392_v8  ;;  %v1356_v16 = vsub.s32 0, %v1353_v15  ;;  %v1362_v18 = vsub.s32 1, %v1353_v15 }
  0x3e   : > { %485 = vmatprep.mubr.f32.mxu0 %v1209_v11  ;;  %497 = vmatprep.mubr.f32.mxu1 %v1209_v11 }
  0x3f   : > { %949 = vmatmul.mubr.msk.f32.vlgmr.msra.gmra.mxu0 %vm408_vm0, %v388_v9  ;;  %951 = vmatmul.mubr.msk.f32.vlgmr.msra.gmra.mxu1 %vm408_vm0, %v390_v10  ;;  %v401_v19 = vrot.slane %v396_v17, %v1356_v16  ;;  %v405_v20 = vrot.slane %v396_v17, %v1362_v18 }
  0x40   : > { %491 = vmatprep.mubr.f32.mxu0 %v1209_v11  ;;  %503 = vmatprep.mubr.f32.mxu1 %v1209_v11 }
  0x43   : > { %950 = vmatmul.mubr.msk.f32.gmra.mxu0 %vm408_vm0, %v389_v12  ;;  %952 = vmatmul.mubr.msk.f32.gmra.mxu1 %vm408_vm0, %v391_v13 }
  0xff   : > { %v487_v21 = vpop.f32.mrf.mxu0  ;;  %v499_v22 = vpop.f32.mrf.mxu1 }
 0x100   : > { %v1366_v23 = vadd.f32 %v499_v22, %v401_v19  ;;  %v1368_v26 = vadd.f32 %v487_v21, %v401_v19 }
 0x101   : > { %v489_v24 = vpop.f32.mrf.mxu0  ;;  %v501_v25 = vpop.f32.mrf.mxu1 }
 0x102   : > { %v1370_v27 = vadd.f32 %v489_v24, %v405_v20  ;;  %v1372_v28 = vadd.f32 %v501_v25, %v405_v20  ;;  %v526_v36 = vmul.f32 %v1366_v23, %v1366_v23  ;;  %v522_v49 = vmul.f32 %v1368_v26, %v1368_v26  ;;  %v586_v24 = vld [vmem:[%s1476_s4] sm:$0x3] }
 0x103   : > { %v493_v29 = vpop.f32.mrf.mxu0  ;;  %v505_v30 = vpop.f32.mrf.mxu1 }
 0x104   : > { %v1374_v31 = vadd.f32 %v505_v30, %v401_v19  ;;  %v516_v32 = vadd.f32 %v1372_v28, %v1366_v23  ;;  %v510_v33 = vadd.f32 %v1370_v27, %v1368_v26  ;;  %v527_v37 = vmul.f32 %v1372_v28, %v1372_v28 }
 0x105   : > { %v495_v34 = vpop.f32.mrf.mxu0  ;;  %v507_v35 = vpop.f32.mrf.mxu1  ;;  %v1384_v38 = vadd.f32 %v493_v29, %v401_v19  ;;  %v523_v47 = vmul.f32 %v1370_v27, %v1370_v27  ;;  %v599_v29 = vrot.slane %v586_v24, %v1356_v16  ;;  %v603_v30 = vrot.slane %v586_v24, %v1362_v18 }
 0x106   : > { %v1386_v39 = vadd.f32 %v495_v34, %v405_v20  ;;  %v1388_v40 = vadd.f32 %v507_v35, %v405_v20  ;;  %517 = vadd.xlane.f32.xlu0 %v516_v32  ;;  %511 = vadd.xlane.f32.xlu1 %v510_v33  ;;  %v536_v41 = vadd.f32 %v527_v37, %v526_v36  ;;  %v566_v20 = vld [vmem:[%s1475_s3] sm:$0x3] }
 0x107   : > { %v528_v43 = vmul.f32 %v1374_v31, %v1374_v31  ;;  %v524_v50 = vmul.f32 %v1384_v38, %v1384_v38  ;;  %v530_v51 = vadd.f32 %v523_v47, %v522_v49  ;;  %v571_v21 = vrot.slane %v566_v20, %v1356_v16 }
 0x108   : > { %v513_v42 = vadd.f32 %v1386_v39, %v1384_v38  ;;  %v529_v44 = vmul.f32 %v1388_v40, %v1388_v40  ;;  %v519_v45 = vadd.f32 %v1388_v40, %v1374_v31  ;;  %v525_v48 = vmul.f32 %v1386_v39, %v1386_v39 }
 0x109   : > { %v575_v22 = vrot.slane %v566_v20, %v1362_v18 }
 0x10a   : > { %537 = vadd.xlane.f32.xlu0 %v536_v41  ;;  %514 = vadd.xlane.f32.xlu1 %v513_v42  ;;  %v539_v46 = vadd.f32 %v529_v44, %v528_v43  ;;  %v533_v52 = vadd.f32 %v525_v48, %v524_v50 }
 0x10e   : > { %520 = vadd.xlane.f32.xlu0 %v519_v45  ;;  %540 = vadd.xlane.f32.xlu1 %v539_v46 }
 0x112   : > { %531 = vadd.xlane.f32.xlu0 %v530_v51  ;;  %534 = vadd.xlane.f32.xlu1 %v533_v52 }
 0x18f   : > { %v518_v53 = vpop.xlane.xlu0 %517  ;;  %v512_v54 = vpop.xlane.xlu1 %511 }
 0x190   : > { %v544_v55 = vmul.f32 0.00625, %v518_v53  ;;  %v542_v61 = vmul.f32 0.00625, %v512_v54 }
 0x192   : > { %v552_v58 = vmul.f32 %v544_v55, %v544_v55  ;;  %v550_v6 = vmul.f32 %v542_v61, %v542_v61 }
 0x193   : > { %v538_v56 = vpop.xlane.xlu0 %537  ;;  %v515_v57 = vpop.xlane.xlu1 %514 }
 0x194   : > { %v548_v59 = vmul.f32 0.00625, %v538_v56  ;;  %v543_v1 = vmul.f32 0.00625, %v515_v57 }
 0x196   : > { %v556_v60 = vsub.f32 %v548_v59, %v552_v58  ;;  %v551_v10 = vmul.f32 %v543_v1, %v543_v1 }
 0x197   : > { %v521_v62 = vpop.xlane.xlu0 %520  ;;  %v541_v63 = vpop.xlane.xlu1 %540 }
 0x198   : > { %v560_v0 = vadd.f32 1e-05, %v556_v60  ;;  %v545_v2 = vmul.f32 0.00625, %v521_v62  ;;  %v549_v4 = vmul.f32 0.00625, %v541_v63 }
 0x19a   : > { %1071 = vrsqrt.f32 %v560_v0  ;;  %v553_v3 = vmul.f32 %v545_v2, %v545_v2 }
 0x19b   : > { %v532_v5 = vpop.xlane.xlu0 %531  ;;  %v535_v7 = vpop.xlane.xlu1 %534 }
 0x19c   : > { %v557_v8 = vsub.f32 %v549_v4, %v553_v3  ;;  %v546_v9 = vmul.f32 0.00625, %v532_v5  ;;  %v547_v11 = vmul.f32 0.00625, %v535_v7 }
 0x19e   : > { %v561_v12 = vadd.f32 1e-05, %v557_v8  ;;  %v554_v13 = vsub.f32 %v546_v9, %v550_v6  ;;  %v555_v14 = vsub.f32 %v547_v11, %v551_v10 }
 0x1a0   : > { %1073 = vrsqrt.f32 %v561_v12  ;;  %v558_v17 = vadd.f32 1e-05, %v554_v13  ;;  %v559_v19 = vadd.f32 1e-05, %v555_v14 }
 0x1a2   : > { %1075 = vrsqrt.f32 %v558_v17 }
 0x1a3   : > { %1077 = vrsqrt.f32 %v559_v19 }
 0x1a7   : > { %v1072_v25 = vpop.eup %1071 }
 0x1a8   : > { %v582_v32 = vmul.f32 %v1072_v25, %v571_v21  ;;  %v583_v33 = vmul.f32 %v1072_v25, %v575_v22 }
 0x1aa   : > { %v591_v34 = vmul.f32 %v582_v32, %v544_v55  ;;  %v592_v35 = vmul.f32 %v583_v33, %v544_v55  ;;  %v618_v41 = vmul.f32 %v582_v32, %v1366_v23  ;;  %v619_v42 = vmul.f32 %v583_v33, %v1372_v28 }
 0x1ac   : > { %v610_v36 = vsub.f32 %v599_v29, %v591_v34  ;;  %v611_v37 = vsub.f32 %v603_v30, %v592_v35 }
 0x1ad   : > { %v1074_v43 = vpop.eup %1073 }
 0x1ae   : > { %v626_v44 = vadd.f32 %v618_v41, %v610_v36  ;;  %v627_v45 = vadd.f32 %v619_v42, %v611_v37  ;;  %v584_v46 = vmul.f32 %v1074_v43, %v571_v21  ;;  %v585_v47 = vmul.f32 %v1074_v43, %v575_v22 }
 0x1af   : > { %v1076_v48 = vpop.eup %1075 }
 0x1b0   : > { %v1078_v49 = vpop.eup %1077  ;;  %v634_v16 = vmax.f32 %v626_v44, 0.0  ;;  %v635_v50 = vmax.f32 %v627_v45, 0.0  ;;  %v593_v18 = vmul.f32 %v584_v46, %v545_v2  ;;  %v594_v51 = vmul.f32 %v585_v47, %v545_v2 }
 0x1b1   : > { %v620_v52 = vmul.f32 %v584_v46, %v1374_v31  ;;  %v621_v53 = vmul.f32 %v585_v47, %v1388_v40  ;;  %v578_v54 = vmul.f32 %v1076_v48, %v571_v21  ;;  %v579_v55 = vmul.f32 %v1076_v48, %v575_v22 }
 0x1b2   : > { %v612_v23 = vsub.f32 %v599_v29, %v593_v18  ;;  %v613_v56 = vsub.f32 %v603_v30, %v594_v51  ;;  %v580_v28 = vmul.f32 %v1078_v49, %v571_v21  ;;  %v581_v57 = vmul.f32 %v1078_v49, %v575_v22 }
 0x1b3   : > { %v587_v58 = vmul.f32 %v578_v54, %v542_v61  ;;  %v588_v59 = vmul.f32 %v579_v55, %v542_v61  ;;  %v614_v60 = vmul.f32 %v578_v54, %v1368_v26  ;;  %v615_v62 = vmul.f32 %v579_v55, %v1370_v27 }
 0x1b4   : > { %v628_v63 = vadd.f32 %v620_v52, %v612_v23  ;;  %v629_v0 = vadd.f32 %v621_v53, %v613_v56  ;;  %v589_v3 = vmul.f32 %v580_v28, %v543_v1  ;;  %v590_v2 = vmul.f32 %v581_v57, %v543_v1 }
 0x1b5   : > { %v606_v4 = vsub.f32 %v599_v29, %v587_v58  ;;  %v607_v31 = vsub.f32 %v603_v30, %v588_v59  ;;  %v616_v40 = vmul.f32 %v580_v28, %v1384_v38  ;;  %v617_v5 = vmul.f32 %v581_v57, %v1386_v39  ;;  %v638_v57 = vld [vmem:[#allocation2] sm:$0xf] }
 0x1b6   : > { %v636_v6 = vmax.f32 %v628_v63, 0.0  ;;  %v637_v7 = vmax.f32 %v629_v0, 0.0  ;;  %v608_v8 = vsub.f32 %v599_v29, %v589_v3  ;;  %v609_v9 = vsub.f32 %v603_v30, %v590_v2 }
 0x1b7   : > { %v622_v10 = vadd.f32 %v614_v60, %v606_v4  ;;  %v623_v61 = vadd.f32 %v615_v62, %v607_v31  ;;  %v1210_v21 = vmov 1983009808  }
 0x1b8   : > { %v653_v11 = vadd.f32 %v636_v6, %v634_v16  ;;  %v660_v26 = vadd.f32 %v637_v7, %v635_v50  ;;  %v624_v12 = vadd.f32 %v616_v40, %v608_v8  ;;  %v625_v27 = vadd.f32 %v617_v5, %v609_v9 }
 0x1b9   : > { %v630_v13 = vmax.f32 %v622_v10, 0.0  ;;  %v631_v14 = vmax.f32 %v623_v61, 0.0  ;;  %v673_v38 = vunpack.c.l.s4 %v1210_v21 }
 0x1ba   : > { %v654_v17 = vrot.slane %v653_v11, 4  ;;  %v661_v1 = vrot.slane %v660_v26, 4  ;;  %v632_v19 = vmax.f32 %v624_v12, 0.0  ;;  %v633_v20 = vmax.f32 %v625_v27, 0.0 }
 0x1bb   : > { %v674_v34 = vunpack.c.0.s8 %v673_v38 }
 0x1bc   : > { %v655_v22 = vadd.f32 %v654_v17, %v653_v11  ;;  %v662_v39 = vadd.f32 %v661_v1, %v660_v26  ;;  %v639_v24 = vadd.f32 %v632_v19, %v630_v13  ;;  %v646_v25 = vadd.f32 %v633_v20, %v631_v14 }
 0x1bd   : > { %v677_v46 = vsub.s32 %v674_v34, %v1353_v15 }
 0x1be   : > { %v656_v29 = vrot.slane %v655_v22, 2  ;;  %v663_v30 = vrot.slane %v662_v39, 2  ;;  %v640_v32 = vrot.slane %v639_v24, 4  ;;  %v647_v33 = vrot.slane %v646_v25, 4 }
 0x1c0   : > { %v657_v35 = vadd.f32 %v656_v29, %v655_v22  ;;  %v664_v36 = vadd.f32 %v663_v30, %v662_v39  ;;  %v641_v37 = vadd.f32 %v640_v32, %v639_v24  ;;  %v648_v41 = vadd.f32 %v647_v33, %v646_v25 }
 0x1c2   : > { %v658_v42 = vrot.slane %v657_v35, 1  ;;  %v665_v43 = vrot.slane %v664_v36, 1  ;;  %v642_v44 = vrot.slane %v641_v37, 2  ;;  %v649_v45 = vrot.slane %v648_v41, 2 }
 0x1c4   : > { %v659_v47 = vadd.f32 %v658_v42, %v657_v35  ;;  %v666_v48 = vadd.f32 %v665_v43, %v664_v36  ;;  %v643_v49 = vadd.f32 %v642_v44, %v641_v37  ;;  %v650_v16 = vadd.f32 %v649_v45, %v648_v41 }
 0x1c6   : > { %v679_v50 = vcombine.low %v659_v47, %v666_v48  ;;  %v644_v18 = vrot.slane %v643_v49, 1  ;;  %v651_v51 = vrot.slane %v650_v16, 1 }
 0x1c8   : > { %v686_v52 = vrot.slane %v679_v50, %v677_v46  ;;  %v645_v53 = vadd.f32 %v644_v18, %v643_v49  ;;  %v652_v54 = vadd.f32 %v651_v51, %v650_v16 }
 0x1ca   : > { %v691_v55 = vrot.slane %v686_v52, 7  ;;  %v671_v23 = vcombine.low %v645_v53, %v652_v54 }
 0x1cc   : > { %v678_v56 = vrot.slane %v671_v23, %v677_v46 }
 0x1ce   : > { %v693_v28 = vsel %vm692_vm1, %v691_v55, %v678_v56 }
 0x1cf   : > { %v695_v15 = vsel %vm694_vm2, %v691_v55, %v693_v28 }
 0x1d0   : > { %v697_v58 = vsel %vm696_vm3, %v691_v55, %v695_v15  ;;  %706 = sbr.rel (%p953_p7) target bundleno = 702 (0x2be), region = 98 }
 0x1d1   : > { %v699_v59 = vsel %vm698_vm4, %v691_v55, %v697_v58 }
 0x1d2   : > { %v701_v60 = vadd.f32 %v699_v59, %v638_v57 }
 0x1d4   : > { %702 = vst [vmem:[#allocation2] sm:$0xf] %v701_v60 }
 0x1d5   : > { %v741_v62 = vld [vmem:[#allocation4 + $0xf8] sm:$0xff]  ;;  %v740_v0 = vld [vmem:[#allocation4 + $0xf0] sm:$0xff]  ;;  %v739_v2 = vld [vmem:[#allocation4 + $0xe8] sm:$0xff] }
 0x1d6   : > { %v725_v63 = vld [vmem:[#allocation4 + $0x78] sm:$0xff]  ;;  %962 = vmatprep.subr.mxu0 %v741_v62  ;;  %v724_v3 = vld [vmem:[#allocation4 + $0x70] sm:$0xff]  ;;  %v723_v4 = vld [vmem:[#allocation4 + $0x68] sm:$0xff] }
 0x1d7   : > { %963 = vmatpush3.msra.mxu0 %v725_v63  ;;  %v738_v31 = vld [vmem:[#allocation4 + $0xe0] sm:$0xff]  ;;  %v737_v5 = vld [vmem:[#allocation4 + $0xd8] sm:$0xff]  ;;  %v736_v7 = vld [vmem:[#allocation4 + $0xd0] sm:$0xff] }
 0x1d8   : > { %964 = vmatprep.subr.mxu0 %v740_v0  ;;  %v722_v40 = vld [vmem:[#allocation4 + $0x60] sm:$0xff]  ;;  %v721_v6 = vld [vmem:[#allocation4 + $0x58] sm:$0xff]  ;;  %v720_v8 = vld [vmem:[#allocation4 + $0x50] sm:$0xff] }
 0x1d9   : > { %965 = vmatpush3.msra.mxu0 %v724_v3  ;;  %v735_v9 = vld [vmem:[#allocation4 + $0xc8] sm:$0xff]  ;;  %v734_v26 = vld [vmem:[#allocation4 + $0xc0] sm:$0xff]  ;;  %v733_v13 = vld [vmem:[#allocation4 + $0xb8] sm:$0xff] }
 0x1da   : > { %966 = vmatprep.subr.mxu0 %v739_v2  ;;  %v719_v61 = vld [vmem:[#allocation4 + $0x48] sm:$0xff]  ;;  %v718_v12 = vld [vmem:[#allocation4 + $0x40] sm:$0xff]  ;;  %v717_v14 = vld [vmem:[#allocation4 + $0x38] sm:$0xff] }
 0x1db   : > { %967 = vmatpush3.msra.mxu0 %v723_v4  ;;  %v707_v10 = vld [vmem:[#allocation2] sm:$0xf]  ;;  %v732_v1 = vld [vmem:[#allocation4 + $0xb0] sm:$0xff]  ;;  %v731_v20 = vld [vmem:[#allocation4 + $0xa8] sm:$0xff] }
 0x1dc   : > { %968 = vmatprep.subr.mxu0 %v738_v31  ;;  %v708_v11 = vmul.f32 0.03125, %v707_v10  ;;  %v716_v19 = vld [vmem:[#allocation4 + $0x30] sm:$0xff]  ;;  %v715_v21 = vld [vmem:[#allocation4 + $0x28] sm:$0xff]  ;;  %v730_v38 = vld [vmem:[#allocation4 + $0xa0] sm:$0xff] }
 0x1dd   : > { %969 = vmatpush3.msra.mxu0 %v722_v40  ;;  %v714_v22 = vld [vmem:[#allocation4 + $0x20] sm:$0xff]  ;;  %v729_v39 = vld [vmem:[#allocation4 + $0x98] sm:$0xff]  ;;  %v728_v25 = vld [vmem:[#allocation4 + $0x90] sm:$0xff] }
 0x1de   : > { %970 = vmatprep.subr.mxu0 %v737_v5  ;;  %709 = vst [vmem:[#allocation7] sm:$0xf] %v708_v11  ;;  %v756_v27 = vrot.slane %v708_v11, %v677_v46  ;;  %v713_v24 = vld [vmem:[#allocation4 + $0x18] sm:$0xff]  ;;  %v712_v29 = vld [vmem:[#allocation4 + $0x10] sm:$0xff]  ;;  %v727_v30 = vld [vmem:[#allocation4 + $0x88] sm:$0xff] }
 0x1df   : > { %971 = vmatpush3.msra.mxu0 %v721_v6  ;;  %v711_v32 = vld [vmem:[#allocation4 + $0x8] sm:$0xff]  ;;  %v726_v33 = vld [vmem:[#allocation4 + $0x80] sm:$0xff]  ;;  %v954_v36 = vld [vmem:[%s1478_s6] ss:$0 sm:$0xff] }
 0x1e0   : > { %972 = vmatprep.subr.mxu0 %v736_v7  ;;  %v757_v17 = vcombine.high %v756_v27, %v756_v27  ;;  %v710_v34 = vld [vmem:[#allocation4] sm:$0xff] }
 0x1e1   : > { %973 = vmatpush3.msra.mxu0 %v720_v8 }
 0x1e2   : > { %974 = vmatprep.subr.mxu0 %v735_v9  ;;  %824 = vmatprep.mubr.f32.mxu0 %v757_v17 }
 0x1e3   : > { %975 = vmatpush3.msra.mxu0 %v719_v61 }
 0x1e4   : > { %976 = vmatprep.subr.mxu0 %v734_v26 }
 0x1e5   : > { %977 = vmatpush3.msra.mxu0 %v718_v12 }
 0x1e6   : > { %978 = vmatprep.subr.mxu0 %v733_v13 }
 0x1e7   : > { %979 = vmatpush3.msra.mxu0 %v717_v14 }
 0x1e8   : > { %980 = vmatprep.subr.mxu0 %v732_v1 }
 0x1e9   : > { %981 = vmatpush3.msra.mxu0 %v716_v19 }
 0x1ea   : > { %982 = vmatprep.subr.mxu0 %v731_v20 }
 0x1eb   : > { %983 = vmatpush3.msra.mxu0 %v715_v21 }
 0x1ec   : > { %984 = vmatprep.subr.mxu0 %v730_v38 }
 0x1ed   : > { %985 = vmatpush3.msra.mxu0 %v714_v22 }
 0x1ee   : > { %986 = vmatprep.subr.mxu0 %v729_v39 }
 0x1ef   : > { %987 = vmatpush3.msra.mxu0 %v713_v24 }
 0x1f0   : > { %988 = vmatprep.subr.mxu0 %v728_v25 }
 0x1f1   : > { %989 = vmatpush3.msra.mxu0 %v712_v29 }
 0x1f2   : > { %990 = vmatprep.subr.mxu0 %v727_v30 }
 0x1f3   : > { %991 = vmatpush3.msra.mxu0 %v711_v32 }
 0x1f4   : > { %992 = vmatprep.subr.mxu0 %v726_v33 }
 0x1f5   : > { %993 = vmatpush3.msra.mxu0 %v710_v34 }
 0x1f6   : > { %825 = vmatmul.mubr.f32.vlgmr.msra.gmra.mxu0 %v756_v27 }
 0x2b6   : > { %v994_v35 = vpop.f32.mrf.mxu0 }
 0x2b8   : > { %v995_v37 = vpop.f32.mrf.mxu0 }
 0x2b9   : > { %v996_v41 = vadd.f32 %v995_v37, %v994_v35 }
 0x2bb   : > { %v827_v42 = vadd.f32 %v996_v41, %v954_v36 }
 0x2bd   : > { %830 = vst [vmem:[#allocation8] sm:$0x3] %v827_v42 }
 0x2be PF: > { %p1431_p8 = scmp.eq.s32.totalorder %s938_s10, 1  ;;  %s1211_s15 = smov [#allocation7]  }
 0x2bf   : > { %s841_s27 = sshll.u32 %s1211_s15, 4  ;;  %s1212_s24 = smov [#allocation8]   ;;  %s842_s27 = int_to_ptr.vmem [resolvable:$true] %s841_s27 }
 0x2c0   : > { %s854_s25 = sshll.u32 %s1212_s24, 4  ;;  %s1105_s26 = scalar_lea.vmem %s842_s27, 64  ;;  %s855_s25 = int_to_ptr.vmem [resolvable:$true] %s854_s25 }
 0x2c1   : > { %p1106_p9 = scmp.ne.s32.totalorder %s842_s27, %s1105_s26  ;;  %p1112_p12 = scmp.lt.s32.totalorder %s842_s27, %s842_s27 }
 0x2c2   : > { %p1113_p13 = scmp.lt.s32.totalorder %s1105_s26, %s1105_s26 }
 0x2c3   : > { %p1107_p10 = pnand %p1106_p9, %p1431_p8 }
 0x2c4   : > { %p1114_p0 = por %p1113_p13, %p1112_p12 }
 0x2c5   : > { %p1108_p11 = pneg %p1107_p10 }
 0x2c7   : > { %p1115_p1 = pnand %p1114_p0, %p1108_p11 }
 0x2c9   : > { %1118 = shalt.err (!%p1115_p1)
}
 0x2ca   : > { %1006 = dma.vmem_to_hbm [thread:$0]  (%p1431_p8), %s842_s27, 64, %s1479_s7, [#allocation6]  }
 0x2cb   : > { %s1129_s12 = scalar_lea.vmem %s855_s25, 32  ;;  %p1136_p6 = scmp.lt.s32.totalorder %s855_s25, %s855_s25 }
 0x2cc   : > { %p1130_p2 = scmp.ne.s32.totalorder %s855_s25, %s1129_s12  ;;  %p1137_p3 = scmp.lt.s32.totalorder %s1129_s12, %s1129_s12 }
 0x2ce   : > { %p1131_p4 = pnand %p1130_p2, %p1431_p8  ;;  %p1138_p7 = por %p1137_p3, %p1136_p6 }
 0x2d0   : > { %p1132_p5 = pneg %p1131_p4 }
 0x2d2   : > { %p1139_p9 = pnand %p1138_p7, %p1132_p5 }
 0x2d4   : > { %1142 = shalt.err (!%p1139_p9)
}
 0x2d5   : > { %1008 = dma.vmem_to_hbm [thread:$0]  (%p1431_p8), %s855_s25, 32, %s1480_s8, [#allocation9]  }
 0x2d6   : > { %1178 = dma.done.wait (%p1431_p8), [#allocation6], 64  }
 0x2d7   : > { %1180 = vsyncadd (%p1431_p8), [#allocation6], 4294967232 }
 0x2d8   : > { %1182 = dma.done.wait (%p1431_p8), [#allocation9], 32  }
 0x2d9   : > { %1184 = vsyncadd (%p1431_p8), [#allocation9], 4294967264 }
 0x2da PF: > { %s22_s9 = sadd.s32 1, %s1203_s9   ;;  %s1485_s27 = smov %s1191_s28 }
 0x2db   : > { %p19_p10 = scmp.ge.s32.totalorder %s22_s9, 4   ;;  %s1486_s28 = smov %s1310_s17 }
 0x2dc   : > { %s1487_s29 = smov %s1199_s30  ;;  %s1488_s30 = smov %s1490_s11 }
 0x2dd   :  { %21 = sbr.rel (!%p19_p10) target bundleno = 5 (0x5), region = 141 }
 0x2e2   :  { %871 = vsyncpa [#allocation5], 1 }
 0x2e3   :  { %873 = vsyncpa [#allocation5 + $0x1], 1 }
 0x2e4   :  { %874 = vsyncpa [#allocation6], 1 }
 0x2e5   :  { %876 = vsyncpa [#allocation6 + $0x1], 1 }
 0x2e6   :  { %877 = vsyncpa [#allocation9], 1 }

</bundles_post_ra>
